<compile_context>
chip_gen: v7x
topology: tpu7x:2x2x1
jax: 0.10.0
libtpu: 0.0.40
codegen_flags: <defaults>
</compile_context>

<pallas_src>
import math
import jax
import jax.numpy as jnp
from jax.experimental import pallas as pl
from jax.experimental.pallas import tpu as pltpu


def _to_class_kernel(x_ref, w_ref, b_ref, o_ref):
    # x_ref: (Bt, in_f)   w_ref: (out_f, in_f)  [lane-dense, native layout]
    # b_ref: (1, out_f)   o_ref: (Bt, out_f)
    acc = jax.lax.dot_general(
        x_ref[...], w_ref[...],
        dimension_numbers=(((1,), (1,)), ((), ())),   # x @ W.T on the MXU
        preferred_element_type=jnp.float32,
    )
    o_ref[...] = jax.nn.sigmoid(acc + b_ref[...]).astype(o_ref.dtype)


def _round_up(n, m):
    return ((n + m - 1) // m) * m


def _round8(n):
    return max(8, ((n + 7) // 8) * 8)


def to_class_forward(x, weight, bias, *, block_b=None, cast_operands_to_bf16=False):
    """y = sigmoid(x @ weight.T + bias)

    x: (B, in_f) f32; weight: (out_f, in_f) f32 (native nn.Linear layout);
    bias: (out_f,) f32. Returns (B, out_f) f32.
    """
    B, in_f = x.shape
    out_f, in_f_w = weight.shape
    assert in_f == in_f_w

    # ---- batch-tile policy ----------------------------------------------
    if block_b is None:
        if B <= 8:
            block_b = B                       # canonical tiny case: one tile
        elif B <= 2048:
            # Aim for >= 2 grid steps so the "parallel" axis can shard across
            # v7x's 2 TensorCores; cap at 1024 (HBM-roofline sweet spot).
            block_b = min(_round8(pl.cdiv(B, 2)), 1024)
        else:
            block_b = 1024
    else:
        block_b = min(block_b, B)             # never build a tile bigger than B
        if block_b != B:
            block_b = _round8(block_b)        # keep the (8, .) sublane constraint

    grid = (pl.cdiv(B, block_b),)

    # ---- optional bf16 operands (halves HBM traffic; f32 accumulation) ----
    op_dtype = jnp.bfloat16 if cast_operands_to_bf16 else jnp.float32
    x_op = x.astype(op_dtype)
    w_op = weight.astype(op_dtype)
    b2 = bias.reshape(1, out_f).astype(jnp.float32)   # 2D for TPU VMEM layout

    # ---- explicit VMEM budget (padded, double-buffered working set) -------
    itx = jnp.dtype(op_dtype).itemsize
    x_tile = _round_up(block_b, 8) * _round_up(in_f, 128) * itx
    o_tile = _round_up(block_b, 8) * _round_up(out_f, 128) * 4
    w_tile = _round_up(out_f, 8) * _round_up(in_f, 128) * itx
    b_tile = 8 * _round_up(out_f, 128) * 4
    working = 2 * (x_tile + o_tile + w_tile + b_tile)    # double-buffered
    vmem_limit = min(int(working * 1.5) + (2 << 20), 48 << 20)

    cost = pl.CostEstimate(
        flops=2 * B * in_f * out_f,
        transcendentals=B * out_f,                        # sigmoid -> exp
        bytes_accessed=(B * in_f + out_f * in_f) * itx + (out_f + B * out_f) * 4,
    )

    return pl.pallas_call(
        _to_class_kernel,
        out_shape=jax.ShapeDtypeStruct((B, out_f), jnp.float32),
        grid=grid,
        in_specs=[
            pl.BlockSpec((block_b, in_f), lambda i: (i, 0)),   # x tile per step
            pl.BlockSpec((out_f, in_f), lambda i: (0, 0)),     # weight resident
            pl.BlockSpec((1, out_f), lambda i: (0, 0)),        # bias resident
        ],
        out_specs=pl.BlockSpec((block_b, out_f), lambda i: (i, 0)),
        compiler_params=pltpu.CompilerParams(
            dimension_semantics=("parallel",),   # batch tiles are independent
            vmem_limit_bytes=vmem_limit,
        ),
        cost_estimate=cost,
    )(x_op, w_op, b2)


if __name__ == "__main__":
    # Module hard-codes in_features = 66*20 = 1320, out_features = 15.
    in_features = 66 * 20
    out_features = 15

    key = jax.random.PRNGKey(0)
    kx, kw, kb, kx2 = jax.random.split(key, 4)

    # Deterministic PyTorch-style Linear init: U(-1/sqrt(in), 1/sqrt(in)).
    bound = 1.0 / math.sqrt(in_features)
    weight = jax.random.uniform(kw, (out_features, in_features),
                                minval=-bound, maxval=bound, dtype=jnp.float32)
    bias = jax.random.uniform(kb, (out_features,),
                              minval=-bound, maxval=bound, dtype=jnp.float32)

    # 1) Canonical tiny-batch case (B=8): single tile, f32 path.
    x = jax.random.normal(kx, (8, in_features), dtype=jnp.float32)
    y = to_class_forward(x, weight, bias)
    jax.block_until_ready(y)
    y_ref = jax.nn.sigmoid(x @ weight.T + bias)
    assert y.shape == (8, out_features)
    assert jnp.allclose(y, y_ref, atol=1e-5, rtol=1e-5)

    # 2) Multi-tile case (B=40): exercises grid >= 2 and a partial last block.
    x2 = jax.random.normal(kx2, (40, in_features), dtype=jnp.float32)
    y2 = to_class_forward(x2, weight, bias)
    jax.block_until_ready(y2)
    y2_ref = jax.nn.sigmoid(x2 @ weight.T + bias)
    assert y2.shape == (40, out_features)
    assert jnp.allclose(y2, y2_ref, atol=1e-5, rtol=1e-5)

    # 3) bf16-operand fast path (f32 accumulation/output); compare against a
    #    bf16-operand reference.
    y2_bf16 = to_class_forward(x2, weight, bias, cast_operands_to_bf16=True)
    jax.block_until_ready(y2_bf16)
    y2_bf16_ref = jax.nn.sigmoid(
        jnp.dot(x2.astype(jnp.bfloat16), weight.astype(jnp.bfloat16).T,
                preferred_element_type=jnp.float32) + bias)
    assert jnp.allclose(y2_bf16, y2_bf16_ref, atol=2e-2, rtol=2e-2)

    print("KERNEL_OK")
</pallas_src>

<mosaic_0001>
module attributes {stable_mosaic.version = 11 : i64} {
  func.func @_to_class_kernel(%arg0: i32, %arg1: memref<8x1320xf32, #tpu.memory_space<vmem>>, %arg2: memref<15x1320xf32, #tpu.memory_space<vmem>>, %arg3: memref<1x15xf32, #tpu.memory_space<vmem>>, %arg4: memref<8x15xf32, #tpu.memory_space<vmem>>) attributes {dimension_semantics = [#tpu.dimension_semantics<parallel>], iteration_bounds = array<i64: 1>, scalar_prefetch = 0 : i64, scratch_operands = 0 : i64, tpu.core_type = #tpu.core_type<tc>, window_params = [{transform_indices = @transform_0, window_bounds = array<i64: 8, 1320>}, {pipeline_mode = #tpu.pipeline_mode<synchronous>, transform_indices = @transform_1, window_bounds = array<i64: 15, 1320>}, {pipeline_mode = #tpu.pipeline_mode<synchronous>, transform_indices = @transform_2, window_bounds = array<i64: 1, 15>}, {transform_indices = @transform_3, window_bounds = array<i64: 8, 15>}]} {
    %c0 = arith.constant 0 : index
    %c0_0 = arith.constant 0 : index
    %0 = vector.load %arg1[%c0, %c0_0] : memref<8x1320xf32, #tpu.memory_space<vmem>>, vector<8x1320xf32>
    %c0_1 = arith.constant 0 : index
    %c0_2 = arith.constant 0 : index
    %1 = vector.load %arg2[%c0_1, %c0_2] : memref<15x1320xf32, #tpu.memory_space<vmem>>, vector<15x1320xf32>
    %cst = arith.constant dense<0.000000e+00> : vector<8x15xf32>
    %2 = tpu.matmul %0, %1, %cst {dimension_numbers = #tpu.dot_dimension_numbers<[1], [1], [0], [0], [0, 0, 1, 0], [], []>} : vector<8x1320xf32>, vector<15x1320xf32>, vector<8x15xf32> -> vector<8x15xf32>
    %c0_3 = arith.constant 0 : index
    %c0_4 = arith.constant 0 : index
    %3 = vector.load %arg3[%c0_3, %c0_4] : memref<1x15xf32, #tpu.memory_space<vmem>>, vector<1x15xf32>
    %4 = vector.broadcast %3 : vector<1x15xf32> to vector<8x15xf32>
    %5 = arith.addf %2, %4 : vector<8x15xf32>
    %6 = arith.negf %5 : vector<8x15xf32>
    %7 = math.exp %6 : vector<8x15xf32>
    %cst_5 = arith.constant 1.000000e+00 : f32
    %8 = vector.broadcast %cst_5 : f32 to vector<8x15xf32>
    %9 = arith.addf %8, %7 : vector<8x15xf32>
    %10 = arith.divf %8, %9 : vector<8x15xf32>
    %c0_6 = arith.constant 0 : index
    %c0_7 = arith.constant 0 : index
    %11 = vector.load %arg4[%c0_6, %c0_7] : memref<8x15xf32, #tpu.memory_space<vmem>>, vector<8x15xf32>
    tpu.vector_store %arg4[%c0_6, %c0_7], %10 {strides = array<i32>} : memref<8x15xf32, #tpu.memory_space<vmem>>, vector<8x15xf32>,
    return
  }
  func.func @transform_0(%arg0: i32) -> (i32, i32) {
    %c0_i32 = arith.constant 0 : i32
    %c0_i32_0 = arith.constant 0 : i32
    return %arg0, %c0_i32 : i32, i32
  }
  func.func @transform_1(%arg0: i32) -> (i32, i32) {
    %c0_i32 = arith.constant 0 : i32
    %c0_i32_0 = arith.constant 0 : i32
    %c0_i32_1 = arith.constant 0 : i32
    return %c0_i32, %c0_i32_0 : i32, i32
  }
  func.func @transform_2(%arg0: i32) -> (i32, i32) {
    %c0_i32 = arith.constant 0 : i32
    %c0_i32_0 = arith.constant 0 : i32
    %c0_i32_1 = arith.constant 0 : i32
    return %c0_i32, %c0_i32_0 : i32, i32
  }
  func.func @transform_3(%arg0: i32) -> (i32, i32) {
    %c0_i32 = arith.constant 0 : i32
    %c0_i32_0 = arith.constant 0 : i32
    return %arg0, %c0_i32 : i32, i32
  }
}

</mosaic_0001>

<bundles_post_ra>
// kernel: tpu_custom_call.1
= control target key start
LH: loop header
LB: loop body
LE: loop exit
PB: predicated region body
PF: predicated region fallthrough
CT: control target
= control target key end

     0   :  { %8 = vsyncpa [#allocation3], 0  ;;  %s745_s0 = inlined_call_operand.hbm [shape: f32[8,1320], index: 0, kind: input, shape index: {}]   ;;  %s746_s1 = inlined_call_operand.hbm [shape: f32[15,1320], index: 1, kind: input, shape index: {}]   ;;  %s747_s2 = inlined_call_operand.vmem [shape: f32[1,15], index: 2, kind: input, shape index: {}]   ;;  %s748_s3 = inlined_call_operand.hbm [shape: f32[8,15], index: 3, kind: output, shape index: {}]  }
   0x1   :  { %9 = vsyncpa [#allocation6], 0 }
   0x2   :  { %10 = vsyncpa [#allocation4], 0  ;;  %s668_s12 = smov [#allocation2]   ;;  %s669_s14 = smov [#allocation5]  }
   0x3   :  { %s17_s13 = sshll.u32 %s668_s12, 4  ;;  %s26_s15 = sshll.u32 %s669_s14, 4  ;;  %s18_s13 = int_to_ptr.vmem [resolvable:$true] %s17_s13  ;;  %s696_s15 = int_to_ptr.vmem [resolvable:$true] %s26_s15 }
   0x4   :  { %s596_s18 = scalar_lea.hbm %s745_s0, 1408 }
   0x5   :  { %p597_p0 = scmp.ne.s32.totalorder %s745_s0, %s596_s18  ;;  %p600_p1 = scmp.lt.u32.totalorder %s596_s18, %s745_s0 }
   0x7   :  { %p602_p2 = pnand %p600_p1, %p597_p0 }
   0x9   :  { %605 = shalt.err (!%p602_p2)
}
   0xa   :  { %s606_s23 = scalar_lea.vmem %s18_s13, 1408  ;;  %p611_p4 = scmp.lt.s32.totalorder %s18_s13, %s18_s13 }
   0xb   :  { %p607_p3 = scmp.ne.s32.totalorder %s18_s13, %s606_s23  ;;  %p612_p5 = scmp.lt.s32.totalorder %s606_s23, %s606_s23 }
   0xd   :  { %p613_p6 = por %p612_p5, %p611_p4 }
   0xf   :  { %p614_p7 = pnand %p613_p6, %p607_p3 }
  0x11   :  { %617 = shalt.err (!%p614_p7)
}
  0x12   :  { %20 = dma.hbm_to_vmem [thread:$0]  %s745_s0, 1408, %s18_s13, [#allocation3]  }
  0x13   :  { %s618_s28 = scalar_lea.hbm %s746_s1, 2816 }
  0x14   :  { %p619_p8 = scmp.ne.s32.totalorder %s746_s1, %s618_s28  ;;  %p622_p9 = scmp.lt.u32.totalorder %s618_s28, %s746_s1 }
  0x16   :  { %p624_p10 = pnand %p622_p9, %p619_p8 }
  0x18   :  { %627 = shalt.err (!%p624_p10)
}
  0x19   :  { %s628_s6 = scalar_lea.vmem %s696_s15, 2816  ;;  %p633_p12 = scmp.lt.s32.totalorder %s696_s15, %s696_s15 }
  0x1a   :  { %p629_p11 = scmp.ne.s32.totalorder %s696_s15, %s628_s6  ;;  %p634_p13 = scmp.lt.s32.totalorder %s628_s6, %s628_s6 }
  0x1c   :  { %p635_p0 = por %p634_p13, %p633_p12 }
  0x1e   :  { %p636_p1 = pnand %p635_p0, %p629_p11 }
  0x20   :  { %639 = shalt.err (!%p636_p1)
}
  0x21   :  { %s670_s0 = smov 1408   ;;  %s671_s7 = smov 88  }
  0x22   :  { %32 = dma.hbm_to_vmem [thread:$0]  %s746_s1, 2816, %s696_s15, [#allocation6], %s670_s0, %s670_s0, %s671_s7  }
  0x23   :  { %662 = dma.done.wait [#allocation3], 1408  }
  0x24   :  { %663 = vsyncadd [#allocation3], 4294965888 }
  0x25   :  { %664 = dma.done.wait [#allocation6], 2816  }
  0x26   :  { %665 = vsyncadd [#allocation6], 4294964480  ;;  %v53_v0 = vld [vmem:[#allocation5 + $0x8] sm:$0xff]  ;;  %v64_v1 = vld [vmem:[#allocation5 + $0x60] sm:$0x7f]  ;;  %v672_v37 = vmov 0.0|0.0  }
  0x27   :  { %v59_v2 = vld [vmem:[#allocation5 + $0x38] sm:$0xff]  ;;  %v550_v3 = vpack.c.bf16 %v64_v1, %v53_v0  ;;  %v70_v4 = vld [vmem:[#allocation5 + $0x90] sm:$0x7f]  ;;  %v52_v5 = vld [vmem:[#allocation5] sm:$0xff]  ;;  %vm81_vm0 = vcmask 326656   ;;  %vm673_vm2 = vmmov 0  }
  0x28   :  { %v63_v6 = vld [vmem:[#allocation5 + $0x58] sm:$0x7f]  ;;  %v562_v7 = vpack.c.bf16 %v70_v4, %v59_v2  ;;  %v58_v9 = vld [vmem:[#allocation5 + $0x30] sm:$0xff]  ;;  %v69_v10 = vld [vmem:[#allocation5 + $0x88] sm:$0x7f]  ;;  %v674_v43 = vmov 0.0  }
  0x29   :  { %v552_v8 = vpack.c.bf16 %v63_v6, %v52_v5  ;;  %v42_v11 = vld [vmem:[#allocation2 + $0x8] sm:$0xff]  ;;  %551 = vmatprep.subr.bf16.mxu1 %v550_v3  ;;  %v564_v12 = vpack.c.bf16 %v69_v10, %v58_v9  ;;  %v48_v13 = vld [vmem:[#allocation2 + $0x38] sm:$0xff]  ;;  %v55_v14 = vld [vmem:[#allocation5 + $0x18] sm:$0xff]  ;;  %s675_s11 = smov [#allocation7]   ;;  %vm517_vm3 = vcmask 121856  }
  0x2a   :  { %155 = vmatprep.mubr.f32.mxu1 %v42_v11  ;;  %563 = vmatprep.subr.bf16.mxu0 %v562_v7  ;;  %v66_v15 = vld [vmem:[#allocation5 + $0x70] sm:$0x7f]  ;;  %v61_v16 = vld [vmem:[#allocation5 + $0x48] sm:$0xff]  ;;  %v72_v18 = vld [vmem:[#allocation5 + $0xa0] sm:$0x7f]  ;;  %s525_s12 = sshll.u32 %s675_s11, 4  ;;  %s526_s12 = int_to_ptr.vmem [resolvable:$true] %s525_s12 }
  0x2b   :  { %553 = vmatpush1.bf16.xpose.msra.mxu1 %v552_v8  ;;  %565 = vmatpush1.bf16.xpose.msra.mxu0 %v564_v12  ;;  %v554_v17 = vpack.c.bf16 %v66_v15, %v55_v14  ;;  %v54_v19 = vld [vmem:[#allocation5 + $0x10] sm:$0xff]  ;;  %v65_v20 = vld [vmem:[#allocation5 + $0x68] sm:$0x7f]  ;;  %v566_v21 = vpack.c.bf16 %v72_v18, %v61_v16  ;;  %v60_v22 = vld [vmem:[#allocation5 + $0x40] sm:$0xff]  ;;  %s640_s13 = scalar_lea.vmem %s526_s12, 128  ;;  %p645_p3 = scmp.lt.s32.totalorder %s526_s12, %s526_s12 }
  0x2c   :  { %365 = vmatprep.mubr.f32.mxu0 %v48_v13  ;;  %v71_v23 = vld [vmem:[#allocation5 + $0x98] sm:$0x7f]  ;;  %v57_v24 = vld [vmem:[#allocation5 + $0x28] sm:$0xff]  ;;  %v556_v26 = vpack.c.bf16 %v65_v20, %v54_v19  ;;  %v68_v27 = vld [vmem:[#allocation5 + $0x80] sm:$0x7f]  ;;  %p641_p2 = scmp.ne.s32.totalorder %s526_s12, %s640_s13  ;;  %p646_p4 = scmp.lt.s32.totalorder %s640_s13, %s640_s13 }
  0x2d   :  { %555 = vmatprep.subr.bf16.mxu1 %v554_v17  ;;  %v41_v25 = vld [vmem:[#allocation2] sm:$0xff]  ;;  %567 = vmatprep.subr.bf16.mxu0 %v566_v21  ;;  %v47_v28 = vld [vmem:[#allocation2 + $0x30] sm:$0xff]  ;;  %v568_v29 = vpack.c.bf16 %v71_v23, %v60_v22  ;;  %v44_v30 = vld [vmem:[#allocation2 + $0x18] sm:$0xff]  ;;  %v558_v31 = vpack.c.bf16 %v68_v27, %v57_v24 }
  0x2e   :  { %v50_v32 = vld [vmem:[#allocation2 + $0x48] sm:$0xff]  ;;  %v56_v33 = vld [vmem:[#allocation5 + $0x20] sm:$0xff]  ;;  %v67_v34 = vld [vmem:[#allocation5 + $0x78] sm:$0x7f]  ;;  %p647_p5 = por %p646_p4, %p645_p3 }
  0x2f   :  { %v62_v35 = vld [vmem:[#allocation5 + $0x50] sm:$0xff]  ;;  %v73_v36 = vld [vmem:[#allocation5 + $0xa8] sm:$0x7f]  ;;  %v43_v38 = vld [vmem:[#allocation2 + $0x10] sm:$0xff]  ;;  %v560_v39 = vpack.c.bf16 %v67_v34, %v56_v33 }
  0x30   :  { %v49_v40 = vld [vmem:[#allocation2 + $0x40] sm:$0xff]  ;;  %v571_v41 = vpack.c.bf16 %v73_v36, %v62_v35  ;;  %vm572_vm1 = vmpackc.low %vm81_vm0, %vm81_vm0  ;;  %v46_v42 = vld [vmem:[#allocation2 + $0x28] sm:$0xff]  ;;  %p648_p6 = pnand %p647_p5, %p641_p2 }
  0x31   :  { %v45_v44 = vld [vmem:[#allocation2 + $0x20] sm:$0xff]  ;;  %v51_v45 = vld [vmem:[#allocation2 + $0x50] sm:$0xff] }
  0x32   :  { %156 = vmatmul.mubr.f32.vlgmr.msra.gmra.mrb[0].mxu1 %v41_v25  ;;  %366 = vmatmul.mubr.f32.vlgmr.msra.gmra.mrb[0].mxu0 %v47_v28  ;;  %v535_v46 = vld [vmem:[%s747_s2] ss:$0 sm:$0xff] }
  0x33   :  { %557 = vmatpush1.bf16.xpose.msra.mxu1 %v556_v26  ;;  %569 = vmatpush1.bf16.xpose.msra.mxu0 %v568_v29 }
  0x34   :  { %225 = vmatprep.mubr.f32.mxu1 %v44_v30  ;;  %435 = vmatprep.mubr.f32.mxu0 %v50_v32 }
  0x35   :  { %559 = vmatprep.subr.bf16.mxu1 %v558_v31  ;;  %570 = vmatprep.subr.bf16.mxu0 %v672_v37 }
  0x3a   :  { %226 = vmatmul.mubr.f32.vlgmr.msra.gmra.mrb[0].mxu1 %v43_v38  ;;  %436 = vmatmul.mubr.f32.vlgmr.msra.gmra.mrb[0].mxu0 %v49_v40 }
  0x3b   :  { %561 = vmatpush1.bf16.xpose.msra.mxu1 %v560_v39  ;;  %573 = vmatpush3.bf16.xpose.msk.msra.mxu0 %vm572_vm1, %v571_v41 }
  0x3c   :  { %295 = vmatprep.mubr.f32.mxu1 %v46_v42  ;;  %547 = vmatprep.mubr.msk.f32.mxu0 %vm673_vm2, %v674_v43 }
  0x42   :  { %296 = vmatmul.mubr.f32.vlgmr.msra.gmra.mrb[0].mxu1 %v45_v44  ;;  %548 = vmatmul.mubr.msk.f32.vlgmr.msra.gmra.mrb[0].mxu0 %vm81_vm0, %v51_v45 }
 0x115   :  { %v297_v47 = vpop.f32.mrb[0].mxu1  ;;  %v507_v49 = vpop.f32.mrb[0].mxu0 }
 0x116   :  { %v574_v48 = vadd.f32 %v535_v46, %v297_v47  ;;  %v299_v50 = vpop.f32.mrb[1].mxu1  ;;  %v549_v51 = vpop.f32.mrb[1].mxu0 }
 0x118   :  { %v575_v52 = vadd.f32 %v574_v48, %v507_v49 }
 0x11a   :  { %v539_v53 = vmul.f32 -1.442695, %v575_v52 }
 0x11c   :  { %592 = vpow2.f32 %v539_v53 }
 0x126   :  { %v593_v54 = vpop.eup %592 }
 0x127   :  { %v514_v55 = vadd.f32 1.0, %v593_v54 }
 0x129   :  { %594 = vrcp.f32 %v514_v55 }
 0x133   :  { %v595_v56 = vpop.eup %594 }
 0x134   :  { %518 = vst.msk [vmem:[#allocation7] sm:$0xff] %vm517_vm3, %v595_v56 }
 0x135   :  { %651 = shalt.err (!%p648_p6)
}
 0x136   :  { %s652_s15 = scalar_lea.hbm %s748_s3, 128 }
 0x137   :  { %p653_p7 = scmp.ne.s32.totalorder %s748_s3, %s652_s15  ;;  %p656_p8 = scmp.lt.u32.totalorder %s652_s15, %s748_s3 }
 0x139   :  { %p658_p9 = pnand %p656_p8, %p653_p7 }
 0x13b   :  { %661 = shalt.err (!%p658_p9)
}
 0x13c   :  { %528 = dma.vmem_to_hbm [thread:$0]  %s526_s12, 128, %s748_s3, [#allocation4]  }
 0x13d   :  { %666 = dma.done.wait [#allocation4], 128  }
 0x13e   :  { %667 = vsyncadd [#allocation4], 4294967168 }
 0x13f   :  { %532 = vsyncpa [#allocation3], 1 }
 0x140   :  { %533 = vsyncpa [#allocation6], 1 }
 0x141   :  { %534 = vsyncpa [#allocation4], 1 }

</bundles_post_ra>
